<compile_context>
chip_gen: v5e
topology: v5e:2x2
jax: 0.10.0
libtpu: 0.0.40
codegen_flags: <defaults>
</compile_context>

<pallas_src>
import math
import functools

import jax
import jax.numpy as jnp
from jax import lax
from jax.experimental import pallas as pl
from jax.experimental.pallas import tpu as pltpu

LN_EPS = 1e-12
_INV_SQRT2 = 1.0 / math.sqrt(2.0)


def _intermediate_kernel(x_ref, w1_ref, b1_ref, w2_ref, b2_ref,
                         gamma_ref, beta_ref, o_ref):
    # x tile: (bm, H) in its native dtype (kept for the f32 residual path).
    x = x_ref[...]

    # dense_1 on the MXU: operands at the weight dtype (f32 or bf16 feed),
    # f32 accumulation.
    h = jnp.dot(x.astype(w1_ref.dtype), w1_ref[...],
                preferred_element_type=jnp.float32)
    h = h + b1_ref[...].astype(jnp.float32)

    # erf-form GELU (matches the PyTorch reference exactly); constant
    # multiply, not a divide.  (tanh-approx gelu would move this VALU work to
    # the EUP slot but changes numerics vs the reference.)
    h = h * 0.5 * (1.0 + lax.erf(h * _INV_SQRT2))

    # dense_2 on the MXU: feed activations at the weight dtype, accumulate f32.
    h = jnp.dot(h.astype(w2_ref.dtype), w2_ref[...],
                preferred_element_type=jnp.float32)
    h = h + b2_ref[...].astype(jnp.float32)

    # TODO(synk): dropout omitted (eval-mode identity); training-mode dropout
    # would use pltpu.prng_seed / pltpu.prng_random_bits.

    # residual + TF-style LayerNorm over the hidden axis (f32, rsqrt on EUP).
    y = h + x.astype(jnp.float32)
    u = jnp.mean(y, axis=-1, keepdims=True)
    d = y - u
    s = jnp.mean(d * d, axis=-1, keepdims=True)
    y = d * lax.rsqrt(s + LN_EPS)
    y = gamma_ref[...].astype(jnp.float32) * y + beta_ref[...].astype(jnp.float32)

    o_ref[...] = y.astype(o_ref.dtype)


def _round_up(n, m):
    return ((n + m - 1) // m) * m


def _vmem_limit_bytes():
    """Generation-aware scoped-VMEM limit: ~112 MiB on 128-MiB parts
    (v5e/v6e), ~56 MiB on 64-MiB parts (v7x)."""
    default_cap = 64 * 1024 * 1024
    try:
        cap = int(getattr(pltpu.get_tpu_info(), "vmem_capacity_bytes",
                          default_cap))
    except Exception:  # interpret mode / non-TPU fallback
        cap = default_cap
    return max(32 * 1024 * 1024, min((cap * 7) // 8, cap - 8 * 1024 * 1024))


def _pick_block_rows(block_rows, M, H, H4, x_itemsize, w_itemsize, vmem_limit):
    # At least two grid steps so the "parallel" row axis can shard across both
    # v7x TensorCores (harmless on single-TC v5e/v6e).
    bm = min(block_rows, max(8, _round_up(-(-M // 2), 8)))
    bm = max(8, _round_up(bm, 8))
    # VMEM budget: resident single-buffered weights + double-buffered x/out
    # row tiles + the live (bm, H4) f32 activation (counted twice across the
    # GELU), with 25% headroom.
    weights = (2 * H * H4 + H4 + 3 * H) * w_itemsize
    per_row = 2 * 2 * H * x_itemsize + 2 * H4 * 4
    budget = (vmem_limit * 3) // 4 - weights
    if budget > 0 and per_row > 0:
        max_rows = max(8, ((budget // per_row) // 8) * 8)
        bm = min(bm, max_rows)
    return bm


@functools.partial(jax.jit, static_argnames=("block_rows", "use_bf16_mxu"))
def intermediate_forward(x, w1, b1, w2, b2, gamma, beta, *,
                         block_rows=1024, use_bf16_mxu=False):
    """x: [B, S, H] -> [B, S, H]"""
    B, S, H = x.shape
    H4 = w1.shape[1]
    M = B * S

    # Optional bf16 MXU feed (v5e/v6e/v7x MXUs are bf16-native; ~2-3x matmul
    # throughput and half the resident-weight VMEM).  Off by default so the
    # f32 path matches the PyTorch reference at f32 tolerance.
    w_dtype = jnp.bfloat16 if use_bf16_mxu else w1.dtype
    w1m = w1.astype(w_dtype)
    w2m = w2.astype(w_dtype)

    vmem_limit = _vmem_limit_bytes()
    bm = _pick_block_rows(block_rows, M, H, H4,
                          x.dtype.itemsize, w1m.dtype.itemsize, vmem_limit)
    M_pad = _round_up(M, bm)

    x2d = x.reshape(M, H)
    if M_pad != M:
        x2d = jnp.pad(x2d, ((0, M_pad - M), (0, 0)))

    # biases / LN params as (1, N) for lane-aligned broadcasting
    b1_2d = b1.reshape(1, H4)
    b2_2d = b2.reshape(1, H)
    g_2d = gamma.reshape(1, H)
    bt_2d = beta.reshape(1, H)

    grid = (M_pad // bm,)

    # Constant-index_map operands are never re-fetched, so single-buffer them
    # (pl.Buffered(1)) -- halves their VMEM footprint vs the default of 2.
    def _resident(shape):
        return pl.BlockSpec(shape, lambda i: (0, 0),
                            pipeline_mode=pl.Buffered(1))

    el = x.dtype.itemsize
    wel = w1m.dtype.itemsize
    cost = pl.CostEstimate(
        flops=4 * M_pad * H * H4,                 # two matmuls: 2*M*(H*4H + 4H*H)
        transcendentals=M_pad * H4,               # erf over the (M, 4H) activation
        bytes_accessed=2 * M_pad * H * el + 2 * H * H4 * wel + (H4 + 3 * H) * 4,
    )

    # TODO(synk): for H >= ~1024 f32 the resident W1/W2 stop fitting v7x's
    # 64 MiB VMEM; that regime needs a K/N-tiled ('arbitrary' grid-over-H4)
    # path with an f32 accumulator in scratch.
    # TODO(synk): with H < 128 the output block is lane-sparse (masked stores)
    # and the MXU contraction/output width is underfilled; a lane-dense repack
    # would require folding independent problems into the lane axis outside
    # the LayerNorm reduction.
    out2d = pl.pallas_call(
        _intermediate_kernel,
        out_shape=jax.ShapeDtypeStruct((M_pad, H), x.dtype),
        grid_spec=pltpu.PrefetchScalarGridSpec(
            num_scalar_prefetch=0,
            grid=grid,
            in_specs=[
                pl.BlockSpec((bm, H), lambda i: (i, 0)),   # x rows (pipelined)
                _resident((H, H4)),                        # W1 (resident)
                _resident((1, H4)),                        # b1
                _resident((H4, H)),                        # W2 (resident)
                _resident((1, H)),                         # b2
                _resident((1, H)),                         # gamma
                _resident((1, H)),                         # beta
            ],
            out_specs=pl.BlockSpec((bm, H), lambda i: (i, 0)),
        ),
        compiler_params=pltpu.CompilerParams(
            dimension_semantics=("parallel",),
            vmem_limit_bytes=vmem_limit,
        ),
        cost_estimate=cost,
    )(x2d, w1m, b1_2d, w2m, b2_2d, g_2d, bt_2d)

    return out2d[:M].reshape(B, S, H)


def _reference(x, w1, b1, w2, b2, gamma, beta):
    h = x @ w1 + b1
    h = h * 0.5 * (1.0 + lax.erf(h / math.sqrt(2.0)))
    h = h @ w2 + b2
    y = h + x
    u = jnp.mean(y, -1, keepdims=True)
    s = jnp.mean((y - u) ** 2, -1, keepdims=True)
    y = (y - u) / jnp.sqrt(s + LN_EPS)
    return gamma * y + beta


if __name__ == "__main__":
    H = 32
    H4 = 4 * H

    key = jax.random.PRNGKey(0)
    kx, k1, k2, k3, k4, kx2 = jax.random.split(key, 6)

    # deterministic "Linear"-style init (fan-in scaled)
    w1 = jax.random.normal(k1, (H, H4), dtype=jnp.float32) / math.sqrt(H)
    b1 = jax.random.normal(k2, (H4,), dtype=jnp.float32) * 0.01
    w2 = jax.random.normal(k3, (H4, H), dtype=jnp.float32) / math.sqrt(H4)
    b2 = jax.random.normal(k4, (H,), dtype=jnp.float32) * 0.01
    gamma = jnp.ones((H,), dtype=jnp.float32)
    beta = jnp.zeros((H,), dtype=jnp.float32)

    # Case 1: nominal small shape (B=2, S=8, H=32); f32 MXU path, strict check.
    x = jax.random.normal(kx, (2, 8, H), dtype=jnp.float32)
    out = jax.block_until_ready(intermediate_forward(x, w1, b1, w2, b2, gamma, beta))
    ref = _reference(x, w1, b1, w2, b2, gamma, beta)
    assert out.shape == x.shape
    assert jnp.allclose(out, ref, atol=2e-5, rtol=2e-5), "mismatch vs reference (case 1)"

    # Case 2: rows not divisible by the tile -> padded-tail path + multi-step grid.
    x2 = jax.random.normal(kx2, (3, 7, H), dtype=jnp.float32)
    out2 = jax.block_until_ready(
        intermediate_forward(x2, w1, b1, w2, b2, gamma, beta, block_rows=8))
    ref2 = _reference(x2, w1, b1, w2, b2, gamma, beta)
    assert out2.shape == x2.shape
    assert jnp.allclose(out2, ref2, atol=2e-5, rtol=2e-5), "mismatch vs reference (case 2)"

    # Case 3: bf16 MXU-feed path (native MXU dtype); looser tolerance vs f32 ref.
    out3 = jax.block_until_ready(
        intermediate_forward(x, w1, b1, w2, b2, gamma, beta, use_bf16_mxu=True))
    assert out3.shape == x.shape
    assert jnp.allclose(out3, ref, atol=5e-2, rtol=5e-2), "mismatch vs reference (case 3, bf16)"

    print("KERNEL_OK")
</pallas_src>

<mosaic_0001>
module attributes {stable_mosaic.version = 11 : i64} {
  func.func @_intermediate_kernel(%arg0: i32, %arg1: memref<8x32xf32, #tpu.memory_space<vmem>>, %arg2: memref<32x128xf32, #tpu.memory_space<vmem>>, %arg3: memref<1x128xf32, #tpu.memory_space<vmem>>, %arg4: memref<128x32xf32, #tpu.memory_space<vmem>>, %arg5: memref<1x32xf32, #tpu.memory_space<vmem>>, %arg6: memref<1x32xf32, #tpu.memory_space<vmem>>, %arg7: memref<1x32xf32, #tpu.memory_space<vmem>>, %arg8: memref<8x32xf32, #tpu.memory_space<vmem>>) attributes {dimension_semantics = [#tpu.dimension_semantics<parallel>], iteration_bounds = array<i64: 2>, scalar_prefetch = 0 : i64, scratch_operands = 0 : i64, tpu.core_type = #tpu.core_type<tc>, window_params = [{transform_indices = @transform_0, window_bounds = array<i64: 8, 32>}, {pipeline_mode = #tpu.pipeline_mode<synchronous>, transform_indices = @transform_1, window_bounds = array<i64: 32, 128>}, {pipeline_mode = #tpu.pipeline_mode<synchronous>, transform_indices = @transform_2, window_bounds = array<i64: 1, 128>}, {pipeline_mode = #tpu.pipeline_mode<synchronous>, transform_indices = @transform_3, window_bounds = array<i64: 128, 32>}, {pipeline_mode = #tpu.pipeline_mode<synchronous>, transform_indices = @transform_4, window_bounds = array<i64: 1, 32>}, {pipeline_mode = #tpu.pipeline_mode<synchronous>, transform_indices = @transform_5, window_bounds = array<i64: 1, 32>}, {pipeline_mode = #tpu.pipeline_mode<synchronous>, transform_indices = @transform_6, window_bounds = array<i64: 1, 32>}, {transform_indices = @transform_7, window_bounds = array<i64: 8, 32>}]} {
    %c0 = arith.constant 0 : index
    %c0_0 = arith.constant 0 : index
    %0 = vector.load %arg1[%c0, %c0_0] : memref<8x32xf32, #tpu.memory_space<vmem>>, vector<8x32xf32>
    %c0_1 = arith.constant 0 : index
    %c0_2 = arith.constant 0 : index
    %1 = vector.load %arg2[%c0_1, %c0_2] : memref<32x128xf32, #tpu.memory_space<vmem>>, vector<32x128xf32>
    %cst = arith.constant dense<0.000000e+00> : vector<8x128xf32>
    %2 = tpu.matmul %0, %1, %cst {dimension_numbers = #tpu.dot_dimension_numbers<[1], [0], [0], [1], [0, 0, 1, 1], [], []>} : vector<8x32xf32>, vector<32x128xf32>, vector<8x128xf32> -> vector<8x128xf32>
    %c0_3 = arith.constant 0 : index
    %c0_4 = arith.constant 0 : index
    %3 = vector.load %arg3[%c0_3, %c0_4] : memref<1x128xf32, #tpu.memory_space<vmem>>, vector<1x128xf32>
    %4 = vector.broadcast %3 : vector<1x128xf32> to vector<8x128xf32>
    %5 = arith.addf %2, %4 : vector<8x128xf32>
    %cst_5 = arith.constant 5.000000e-01 : f32
    %6 = vector.broadcast %cst_5 : f32 to vector<8x128xf32>
    %7 = arith.mulf %5, %6 : vector<8x128xf32>
    %cst_6 = arith.constant 0.707106769 : f32
    %8 = vector.broadcast %cst_6 : f32 to vector<8x128xf32>
    %9 = arith.mulf %5, %8 : vector<8x128xf32>
    %10 = math.erf %9 : vector<8x128xf32>
    %cst_7 = arith.constant 1.000000e+00 : f32
    %11 = vector.broadcast %cst_7 : f32 to vector<8x128xf32>
    %12 = arith.addf %11, %10 : vector<8x128xf32>
    %13 = arith.mulf %7, %12 : vector<8x128xf32>
    %c0_8 = arith.constant 0 : index
    %c0_9 = arith.constant 0 : index
    %14 = vector.load %arg4[%c0_8, %c0_9] : memref<128x32xf32, #tpu.memory_space<vmem>>, vector<128x32xf32>
    %cst_10 = arith.constant dense<0.000000e+00> : vector<8x32xf32>
    %15 = tpu.matmul %13, %14, %cst_10 {dimension_numbers = #tpu.dot_dimension_numbers<[1], [0], [0], [1], [0, 0, 1, 1], [], []>} : vector<8x128xf32>, vector<128x32xf32>, vector<8x32xf32> -> vector<8x32xf32>
    %c0_11 = arith.constant 0 : index
    %c0_12 = arith.constant 0 : index
    %16 = vector.load %arg5[%c0_11, %c0_12] : memref<1x32xf32, #tpu.memory_space<vmem>>, vector<1x32xf32>
    %17 = vector.broadcast %16 : vector<1x32xf32> to vector<8x32xf32>
    %18 = arith.addf %15, %17 : vector<8x32xf32>
    %19 = arith.addf %18, %0 : vector<8x32xf32>
    %cst_13 = arith.constant dense<0.000000e+00> : vector<8xf32>
    %20 = vector.multi_reduction <add>, %19, %cst_13 [1] : vector<8x32xf32> to vector<8xf32>
    %21 = vector.shape_cast %20 : vector<8xf32> to vector<8x1xf32>
    %cst_14 = arith.constant 3.200000e+01 : f32
    %22 = vector.broadcast %cst_14 : f32 to vector<8x1xf32>
    %23 = arith.divf %21, %22 : vector<8x1xf32>
    %24 = vector.broadcast %23 : vector<8x1xf32> to vector<8x32xf32>
    %25 = arith.subf %19, %24 : vector<8x32xf32>
    %26 = arith.mulf %25, %25 : vector<8x32xf32>
    %cst_15 = arith.constant dense<0.000000e+00> : vector<8xf32>
    %27 = vector.multi_reduction <add>, %26, %cst_15 [1] : vector<8x32xf32> to vector<8xf32>
    %28 = vector.shape_cast %27 : vector<8xf32> to vector<8x1xf32>
    %cst_16 = arith.constant 3.200000e+01 : f32
    %29 = vector.broadcast %cst_16 : f32 to vector<8x1xf32>
    %30 = arith.divf %28, %29 : vector<8x1xf32>
    %cst_17 = arith.constant 9.99999996E-13 : f32
    %31 = vector.broadcast %cst_17 : f32 to vector<8x1xf32>
    %32 = arith.addf %30, %31 : vector<8x1xf32>
    %33 = math.rsqrt %32 : vector<8x1xf32>
    %34 = vector.broadcast %33 : vector<8x1xf32> to vector<8x32xf32>
    %35 = arith.mulf %25, %34 : vector<8x32xf32>
    %c0_18 = arith.constant 0 : index
    %c0_19 = arith.constant 0 : index
    %36 = vector.load %arg6[%c0_18, %c0_19] : memref<1x32xf32, #tpu.memory_space<vmem>>, vector<1x32xf32>
    %37 = vector.broadcast %36 : vector<1x32xf32> to vector<8x32xf32>
    %38 = arith.mulf %37, %35 : vector<8x32xf32>
    %c0_20 = arith.constant 0 : index
    %c0_21 = arith.constant 0 : index
    %39 = vector.load %arg7[%c0_20, %c0_21] : memref<1x32xf32, #tpu.memory_space<vmem>>, vector<1x32xf32>
    %40 = vector.broadcast %39 : vector<1x32xf32> to vector<8x32xf32>
    %41 = arith.addf %38, %40 : vector<8x32xf32>
    %c0_22 = arith.constant 0 : index
    %c0_23 = arith.constant 0 : index
    %42 = vector.load %arg8[%c0_22, %c0_23] : memref<8x32xf32, #tpu.memory_space<vmem>>, vector<8x32xf32>
    tpu.vector_store %arg8[%c0_22, %c0_23], %41 {strides = array<i32>} : memref<8x32xf32, #tpu.memory_space<vmem>>, vector<8x32xf32>,
    return
  }
  func.func @transform_0(%arg0: i32) -> (i32, i32) {
    %c0_i32 = arith.constant 0 : i32
    %c0_i32_0 = arith.constant 0 : i32
    return %arg0, %c0_i32 : i32, i32
  }
  func.func @transform_1(%arg0: i32) -> (i32, i32) {
    %c0_i32 = arith.constant 0 : i32
    %c0_i32_0 = arith.constant 0 : i32
    %c0_i32_1 = arith.constant 0 : i32
    return %c0_i32, %c0_i32_0 : i32, i32
  }
  func.func @transform_2(%arg0: i32) -> (i32, i32) {
    %c0_i32 = arith.constant 0 : i32
    %c0_i32_0 = arith.constant 0 : i32
    %c0_i32_1 = arith.constant 0 : i32
    return %c0_i32, %c0_i32_0 : i32, i32
  }
  func.func @transform_3(%arg0: i32) -> (i32, i32) {
    %c0_i32 = arith.constant 0 : i32
    %c0_i32_0 = arith.constant 0 : i32
    %c0_i32_1 = arith.constant 0 : i32
    return %c0_i32, %c0_i32_0 : i32, i32
  }
  func.func @transform_4(%arg0: i32) -> (i32, i32) {
    %c0_i32 = arith.constant 0 : i32
    %c0_i32_0 = arith.constant 0 : i32
    %c0_i32_1 = arith.constant 0 : i32
    return %c0_i32, %c0_i32_0 : i32, i32
  }
  func.func @transform_5(%arg0: i32) -> (i32, i32) {
    %c0_i32 = arith.constant 0 : i32
    %c0_i32_0 = arith.constant 0 : i32
    %c0_i32_1 = arith.constant 0 : i32
    return %c0_i32, %c0_i32_0 : i32, i32
  }
  func.func @transform_6(%arg0: i32) -> (i32, i32) {
    %c0_i32 = arith.constant 0 : i32
    %c0_i32_0 = arith.constant 0 : i32
    %c0_i32_1 = arith.constant 0 : i32
    return %c0_i32, %c0_i32_0 : i32, i32
  }
  func.func @transform_7(%arg0: i32) -> (i32, i32) {
    %c0_i32 = arith.constant 0 : i32
    %c0_i32_0 = arith.constant 0 : i32
    return %arg0, %c0_i32 : i32, i32
  }
}

</mosaic_0001>

<bundles_post_ra>
// kernel: intermediate_forward.1
= control target key start
LH: loop header
LB: loop body
LE: loop exit
PB: predicated region body
PF: predicated region fallthrough
CT: control target
= control target key end

     0   :  { %12 = vsyncpa [#allocation3], 0  ;;  %s839_s0 = inlined_call_operand.vmem [shape: f32[16,32], index: 0, kind: input, shape index: {}]   ;;  %s840_s1 = inlined_call_operand.vmem [shape: f32[32,128], index: 1, kind: input, shape index: {}]   ;;  %s841_s2 = inlined_call_operand.vmem [shape: f32[1,128], index: 2, kind: input, shape index: {}]   ;;  %s842_s3 = inlined_call_operand.vmem [shape: f32[128,32], index: 3, kind: input, shape index: {}]   ;;  %s843_s4 = inlined_call_operand.vmem [shape: f32[1,32], index: 4, kind: input, shape index: {}]   ;;  %s844_s5 = inlined_call_operand.vmem [shape: f32[1,32], index: 5, kind: input, shape index: {}]   ;;  %s845_s6 = inlined_call_operand.vmem [shape: f32[1,32], index: 6, kind: input, shape index: {}]   ;;  %s846_s7 = inlined_call_operand.hbm [shape: f32[16,32], index: 7, kind: output, shape index: {}]  }
   0x1   :  { %14 = vsyncpa [#allocation3 + $0x1], 0  ;;  %s674_s24 = smov 0   ;;  %s676_s25 = smov 0  }
   0x2   :  { %s678_s26 = smov 0   ;;  %s680_s27 = smov 0  }
   0x3 LB: > { %s695_s28 = sadd.s32 4294967295, %s631_s27   ;;  %s507_s29 = sadd.s32 4294967294, %s631_s27   ;;  %s631_s27 = sphi %s680_s27, %s852_s27   ;;  %s627_s26 = sphi %s678_s26, %s851_s26   ;;  %s623_s25 = sphi %s676_s25, %s850_s25   ;;  %s619_s24 = sphi %s674_s24, %s849_s24  }
   0x4   : > { %s699_s30 = sadd.s32 1, %s631_s27   ;;  %s179_s8 = sadd.s32 1, %s627_s26 }
   0x5   : > { %s176_s9 = ssub.s32 %s631_s27, %s699_s30  ;;  %p189_p0 = scmp.ne.s32.totalorder %s627_s26, %s623_s25 }
   0x6   : > { %p177_p1 = scmp.eq.s32.totalorder %s176_s9, 0  ;;  %p190_p2 = scmp.eq.s32.totalorder %s695_s28, 1 }
   0x7   : > { %p195_p3 = scmp.ne.s32.totalorder %s623_s25, %s619_s24  ;;  %p196_p4 = scmp.eq.s32.totalorder %s507_s29, 1 }
   0x8   : > { %s710_s10 = scalar_select %p177_p1, %s627_s26, %s179_s8  }
   0x9   : > { %p712_p5 = por %p190_p2, %p189_p0  ;;  %p716_p6 = por %p196_p4, %p195_p3 }
   0xa   : > { %p510_p7 = scmp.ge.s32.totalorder %s631_s27, 1  ;;  %p239_p8 = scmp.lt.s32.totalorder %s631_s27, 3 }
   0xc   : > { %p240_p9 = pnand %p510_p7, %p239_p8 }
   0xd   : > { %p270_p10 = scmp.lt.s32.totalorder (!%p240_p9), %s695_s28, 1  ;;  %s267_s20 = sand.u32 (!%p240_p9), 1, %s623_s25  }
   0xe   : > { %243 = sbr.rel (%p240_p9) target bundleno = 607 (0x25f), region = 48  ;;  %s511_s21 = sshll.u32 (!%p240_p9), %s267_s20, 3 }
   0xf   : > { %s269_s16 = scalar_lea.vmem (!%p240_p9), [#allocation2], %s511_s21  ;;  %s433_s18 = scalar_lea.sflag (!%p240_p9), [#allocation3], %s267_s20 }
  0x10   : > { %s589_s21 = scalar_lea.hbm (!%p240_p9), %s846_s7, 16 }
  0x13   : > { %v278_v0 = vld [vmem:[%s840_s1 + $0x18] sm:$0xff]  ;;  %v277_v1 = vld [vmem:[%s840_s1 + $0x10] sm:$0xff]  ;;  %v276_v2 = vld [vmem:[%s840_s1 + $0x8] sm:$0xff]  ;;  %s271_s19 = scalar_select %p270_p10, %s695_s28, 1  ;;  %vm283_vm0 = vcmask 261120  }
  0x14   : > { %299 = vmatpush.msra.mxu0 %v278_v0  ;;  %v275_v3 = vld [vmem:[%s840_s1] sm:$0xff]  ;;  %v366_v5 = vld [vmem:[%s842_s3 + $0x78] sm:$0xff]  ;;  %v365_v6 = vld [vmem:[%s842_s3 + $0x70] sm:$0xff] }
  0x15   : > { %s512_s22 = sshll.u32 %s271_s19, 3  ;;  %371 = vmatpush.msra.mxu1 %v366_v5  ;;  %v364_v7 = vld [vmem:[%s842_s3 + $0x68] sm:$0xff]  ;;  %v363_v8 = vld [vmem:[%s842_s3 + $0x60] sm:$0xff]  ;;  %v362_v10 = vld [vmem:[%s842_s3 + $0x58] sm:$0xff]  ;;  %v633_v5 = vmov 32.0  }
  0x16   : > { %300 = vmatpush.msra.mxu0 %v277_v1  ;;  %s273_s8 = scalar_lea.vmem %s839_s0, %s512_s22  ;;  %v559_v9 = vld [vmem:[%s841_s2] ss:$0 sm:$0xff]  ;;  %v361_v11 = vld [vmem:[%s842_s3 + $0x50] sm:$0xff]  ;;  %v360_v13 = vld [vmem:[%s842_s3 + $0x48] sm:$0xff]  ;;  %s516_s22 = sshll.u32 %s695_s28, 3 }
  0x17   : > { %v739_v4 = vld [vmem:[%s273_s8] sm:$0xff]  ;;  %372 = vmatpush.msra.mxu1 %v365_v6  ;;  %v358_v17 = vld [vmem:[%s842_s3 + $0x38] sm:$0xff]  ;;  %v357_v19 = vld [vmem:[%s842_s3 + $0x30] sm:$0xff]  ;;  %s443_s13 = scalar_lea.hbm %s846_s7, %s516_s22  ;;  %s445_s28 = sshll.u32 %s269_s16, 4  ;;  %s446_s28 = int_to_ptr.vmem [resolvable:$true] %s445_s28 }
  0x18   : > { %301 = vmatpush.msra.mxu0 %v276_v2  ;;  %v359_v15 = vld [vmem:[%s842_s3 + $0x40] sm:$0xff]  ;;  %v356_v21 = vld [vmem:[%s842_s3 + $0x28] sm:$0xff]  ;;  %v354_v27 = vld [vmem:[%s842_s3 + $0x18] sm:$0xff]  ;;  %s447_s17 = sshll.u32 %s443_s13, 4  ;;  %s448_s17 = int_to_ptr.hbm [resolvable:$true] %s447_s17 }
  0x19   : > { %373 = vmatpush.msra.mxu1 %v364_v7  ;;  %v355_v24 = vld [vmem:[%s842_s3 + $0x20] sm:$0xff]  ;;  %v353_v30 = vld [vmem:[%s842_s3 + $0x10] sm:$0xff]  ;;  %v352_v33 = vld [vmem:[%s842_s3 + $0x8] sm:$0xff]  ;;  %s583_s19 = sshra.s32 %s448_s17, 4  ;;  %s584_s19 = int_to_ptr.hbm [resolvable:$true] %s583_s19 }
  0x1a   : > { %302 = vmatpush.msra.mxu0 %v275_v3  ;;  %v351_v35 = vld [vmem:[%s842_s3] sm:$0xff]  ;;  %s585_s22 = scalar_lea.hbm %s584_s19, 8  ;;  %p590_p0 = scmp.lt.s32.totalorder %s584_s19, %s846_s7 }
  0x1b   : > { %513 = vmatmul.msk.f32.vlgmr.msra.gmra.mxu0 %vm283_vm0, %v739_v4  ;;  %374 = vmatpush.msra.mxu1 %v363_v8  ;;  %v560_v63 = vld [vmem:[%s843_s4] ss:$0 sm:$0xff]  ;;  %p586_p11 = scmp.ne.s32.totalorder %s584_s19, %s585_s22  ;;  %p591_p1 = scmp.lt.s32.totalorder %s589_s21, %s585_s22 }
  0x1d   : > { %375 = vmatpush.msra.mxu1 %v362_v10  ;;  %p587_p12 = pnand %p586_p11, %p712_p5  ;;  %p592_p2 = por %p591_p1, %p590_p0 }
  0x1f   : > { %376 = vmatpush.msra.mxu1 %v361_v11  ;;  %p588_p13 = pneg %p587_p12 }
  0x21   : > { %377 = vmatpush.msra.mxu1 %v360_v13  ;;  %p593_p3 = pnand %p592_p2, %p588_p13 }
  0x23   : > { %378 = vmatpush.msra.mxu1 %v359_v15 }
  0x25   : > { %379 = vmatpush.msra.mxu1 %v358_v17 }
  0x27   : > { %380 = vmatpush.msra.mxu1 %v357_v19 }
  0x29   : > { %381 = vmatpush.msra.mxu1 %v356_v21 }
  0x2b   : > { %382 = vmatpush.msra.mxu1 %v355_v24 }
  0x2d   : > { %383 = vmatpush.msra.mxu1 %v354_v27 }
  0x2f   : > { %384 = vmatpush.msra.mxu1 %v353_v30 }
  0x31   : > { %385 = vmatpush.msra.mxu1 %v352_v33 }
  0x33   : > { %386 = vmatpush.msra.mxu1 %v351_v35 }
  0x98   : > { %v304_v12 = vpop.f32.mrf.mxu0 }
  0x99   : > { %v305_v14 = vadd.f32 %v559_v9, %v304_v12 }
  0x9b   : > { %v308_v16 = vmul.f32 0.70710677, %v305_v14  ;;  %v307_v60 = vmul.f32 0.5, %v305_v14 }
  0x9d   : > { %v309_v18 = vmul.f32 %v308_v16, %v308_v16 }
  0x9f   : > { %v310_v20 = vmin.f32 %v309_v18, 16.0 }
  0xa1   : > { %v311_v22 = vmul.f32 2.1237322e-06, %v310_v20  ;;  %v322_v23 = vmul.f32 3.8918573e-05, %v310_v20 }
  0xa3   : > { %v312_v25 = vadd.f32 0.00028619796, %v311_v22  ;;  %v323_v26 = vadd.f32 0.001143296, %v322_v23 }
  0xa5   : > { %v313_v28 = vmul.f32 %v312_v25, %v310_v20  ;;  %v324_v29 = vmul.f32 %v323_v26, %v310_v20  ;;  %v561_v25 = vld [vmem:[%s844_s5] ss:$0 sm:$0xff] }
  0xa7   : > { %v325_v31 = vadd.f32 0.014752088, %v324_v29  ;;  %v314_v32 = vadd.f32 0.0036580483, %v313_v28  ;;  %v562_v28 = vld [vmem:[%s845_s6] ss:$0 sm:$0xff] }
  0xa9   : > { %v326_v34 = vmul.f32 %v325_v31, %v310_v20  ;;  %v315_v37 = vmul.f32 %v314_v32, %v310_v20 }
  0xab   : > { %v327_v36 = vadd.f32 0.112945676, %v326_v34  ;;  %v316_v40 = vadd.f32 0.05243302, %v315_v37 }
  0xad   : > { %v328_v38 = vmul.f32 %v327_v36, %v310_v20  ;;  %v317_v43 = vmul.f32 %v316_v40, %v310_v20 }
  0xaf   : > { %v329_v39 = vadd.f32 0.4994258, %v328_v38  ;;  %v318_v44 = vadd.f32 0.18741608, %v317_v43 }
  0xb1   : > { %v330_v41 = vmul.f32 %v329_v39, %v310_v20  ;;  %v319_v46 = vmul.f32 %v318_v44, %v310_v20 }
  0xb3   : > { %v331_v42 = vadd.f32 1.0, %v330_v41  ;;  %v320_v50 = vadd.f32 1.1283791, %v319_v46 }
  0xb5   : > { %563 = vrcp.f32 %v331_v42  ;;  %v343_v49 = vand.u32 2147483648, %v331_v42  ;;  %v341_v52 = vand.u32 2147483647, %v331_v42  ;;  %vm337_vm2 = vweird.f32 %v331_v42 }
  0xb6   : > { %v321_v55 = vmul.f32 %v320_v50, %v308_v16  ;;  %565 = vrcp.f32 %v633_v5 }
  0xb7   : > { %v344_v54 = vor.u32 1.1754944e-38, %v343_v49  ;;  %vm342_vm4 = vcmp.eq.f32.partialorder %v341_v52, 8.507059e+37 }
  0xbb   : > { %v564_v45 = vpop.eup %563 }
  0xbc   : > { %v333_v47 = vmul.f32 %v564_v45, %v331_v42  ;;  %vm338_vm1 = vweird.f32 %v564_v45  ;;  %v566_v6 = vpop.eup %565 }
  0xbd   : > { %vm339_vm3 = vmor %vm337_vm2, %vm338_vm1  ;;  %v396_v7 = vmul.f32 32.0, %v566_v6  ;;  %vm400_vm5 = vweird.f32 %v566_v6 }
  0xbe   : > { %v334_v48 = vsub.f32 1.0, %v333_v47 }
  0xbf   : > { %v397_v8 = vsub.f32 1.0, %v396_v7 }
  0xc0   : > { %v335_v51 = vmul.f32 %v564_v45, %v334_v48 }
  0xc1   : > { %v398_v9 = vmul.f32 %v566_v6, %v397_v8 }
  0xc2   : > { %v336_v53 = vadd.f32 %v564_v45, %v335_v51 }
  0xc3   : > { %v399_v10 = vadd.f32 %v566_v6, %v398_v9 }
  0xc4   : > { %v340_v56 = vsel %vm339_vm3, %v564_v45, %v336_v53 }
  0xc5   : > { %v345_v57 = vsel %vm342_vm4, %v344_v54, %v340_v56  ;;  %v401_v11 = vsel %vm400_vm5, %v566_v6, %v399_v10 }
  0xc6   : > { %v346_v58 = vmul.f32 %v345_v57, %v321_v55 }
  0xc8   : > { %v514_v59 = vclamps-f32 %v346_v58, 1.0 }
  0xca   : > { %v349_v61 = vadd.f32 1.0, %v514_v59 }
  0xcc   : > { %v350_v62 = vmul.f32 %v349_v61, %v307_v60 }
  0xce   : > { %387 = vmatmul.f32.vlgmr.msra.gmra.mxu1 %v350_v62 }
 0x14b   : > { %v388_v0 = vpop.f32.mrf.mxu1 }
 0x14c   : > { %v389_v1 = vadd.f32 %v560_v63, %v388_v0 }
 0x14e   : > { %v391_v2 = vadd.f32 %v389_v1, %v739_v4 }
 0x150   : > { %v392_v3 = vsel %vm283_vm0, %v391_v2, 0.0 }
 0x151   : > { %393 = vadd.xlane.f32.xlu0 %v392_v3 }
 0x1c4   : > { %v394_v12 = vpop.xlane.xlu0 %393 }
 0x1c5   : > { %v402_v13 = vmul.f32 %v401_v11, %v394_v12 }
 0x1c7   : > { %v403_v14 = vsub.f32 %v391_v2, %v402_v13 }
 0x1c9   : > { %v404_v15 = vmul.f32 %v403_v14, %v403_v14 }
 0x1cb   : > { %v405_v4 = vsel %vm283_vm0, %v404_v15, 0.0 }
 0x1cc   : > { %406 = vadd.xlane.f32.xlu0 %v405_v4 }
 0x23f   : > { %v407_v16 = vpop.xlane.xlu0 %406 }
 0x240   : > { %v408_v17 = vmul.f32 %v407_v16, %v401_v11 }
 0x242   : > { %v409_v18 = vadd.f32 1e-12, %v408_v17 }
 0x244   : > { %567 = vrsqrt.f32 %v409_v18  ;;  %vm416_vm7 = vweird.f32 %v409_v18 }
 0x24a   : > { %v568_v19 = vpop.eup %567 }
 0x24b   : > { %v411_v20 = vmul.f32 %v568_v19, %v409_v18  ;;  %vm417_vm6 = vweird.f32 %v568_v19 }
 0x24c   : > { %vm418_vm8 = vmor %vm416_vm7, %vm417_vm6 }
 0x24d   : > { %v412_v21 = vmul.f32 %v568_v19, %v411_v20 }
 0x24f   : > { %v413_v22 = vmul.f32 0.5, %v412_v21 }
 0x251   : > { %v414_v23 = vsub.f32 1.5, %v413_v22 }
 0x253   : > { %v415_v24 = vmul.f32 %v568_v19, %v414_v23 }
 0x255   : > { %v419_v26 = vsel %vm418_vm8, %v568_v19, %v415_v24 }
 0x256   : > { %v420_v27 = vmul.f32 %v419_v26, %v403_v14 }
 0x258   : > { %v425_v29 = vmul.f32 %v561_v25, %v420_v27 }
 0x25a   : > { %v430_v30 = vadd.f32 %v562_v28, %v425_v29 }
 0x25c   : > { %431 = vst.msk [vmem:[%s269_s16] sm:$0xff] %vm283_vm0, %v430_v30 }
 0x25d   : > { %596 = shalt.err (!%p593_p3)
}
 0x25e   : > { %519 = dma.vmem_to_hbm [thread:$0]  (%p712_p5), %s446_s28, 128, %s448_s17, %s433_s18  }
 0x25f PF: > { %p525_p4 = scmp.ge.s32.totalorder %s631_s27, 2  ;;  %s459_s20 = sand.u32 1, %s619_s24  }
 0x260   : > { %s460_s13 = scalar_lea.sflag [#allocation3], %s459_s20 }
 0x261   : > { %p522_p7 = pnand %p525_p4, %p716_p6 }
 0x263   : > { %p523_p8 = pneg %p522_p7 }
 0x265   : > { %614 = dma.done.wait (%p523_p8), %s460_s13, 128  }
 0x266   : > { %616 = vsyncadd (%p523_p8), %s460_s13, 4294967168  ;;  %p17_p9 = scmp.ge.s32.totalorder %s699_s30, 4   ;;  %s849_s24 = smov %s623_s25 }
 0x267   : > { %s850_s25 = smov %s627_s26  ;;  %s851_s26 = smov %s710_s10 }
 0x268   : > { %s852_s27 = smov %s699_s30  ;;  %19 = sbr.rel (!%p17_p9) target bundleno = 3 (0x3), region = 83 }
 0x26d   :  { %466 = vsyncpa [#allocation3], 1 }
 0x26e   :  { %468 = vsyncpa [#allocation3 + $0x1], 1 }

</bundles_post_ra>
